<compile_context>
chip_gen: v5e
topology: v5e:2x2
jax: 0.10.0
libtpu: 0.0.40
codegen_flags: <defaults>
</compile_context>

<pallas_src>
import functools

import jax
import jax.numpy as jnp
from jax.experimental import pallas as pl
from jax.experimental.pallas import tpu as pltpu

_MIB = 1024 * 1024


def _round_up(x, m):
    return ((x + m - 1) // m) * m


def _cdiv(a, b):
    return (a + b - 1) // b


def _vmem_capacity_bytes(default=64 * _MIB):
    """Physical VMEM per TensorCore; conservative default if the query fails."""
    try:
        info = pltpu.get_tpu_info()
        for attr in ("vmem_capacity_bytes", "vmem_bytes", "vmem_size_bytes"):
            val = getattr(info, attr, None)
            if val:
                return int(val)
    except Exception:
        pass
    return default


def _estimate_vmem_bytes(tm, ti, H, out_itemsize, weight_resident):
    """Per-grid-step resident VMEM, including the fused GELU intermediate."""
    bf16, f32 = 2, 4
    w_bufs = 1 if weight_resident else 3            # Buffered(1) vs Buffered(3)
    weights = 2 * H * ti * bf16 * w_bufs             # W_fc slice + W_proj slice
    biases = 2 * (ti + H) * f32                      # b_fc slice + b_proj (small)
    x_io = 2 * tm * H * bf16                         # double-buffered input rows
    out_io = 2 * tm * H * out_itemsize               # double-buffered output rows
    gelu = tm * ti * (f32 + bf16)                    # fused h (f32) + bf16 recast
    acc = 0 if weight_resident else tm * H * f32     # f32 scratch accumulator
    return weights + biases + x_io + out_io + gelu + acc


def _gelu(h, approx):
    if approx:
        # tanh 'gelu_new' form: transcendental goes to the otherwise-idle EUP slot.
        c = jnp.float32(0.7978845608028654)  # sqrt(2/pi)
        return 0.5 * h * (1.0 + jnp.tanh(c * (h + 0.044715 * h * h * h)))
    # Exact erf GELU, matching torch.nn.GELU() in the reference module.
    return 0.5 * h * (1.0 + jax.lax.erf(h * jnp.float32(0.7071067811865476)))


def _mlp_kernel_resident(x_ref, w_fc_ref, b_fc_ref, w_proj_ref, b_proj_ref,
                         o_ref, *, approx_gelu):
    """Weight-resident variant: single reduction step -> write o_ref directly
    (no f32 scratch accumulator, no pl.when, no read-modify-write traffic)."""
    h = jnp.dot(x_ref[...], w_fc_ref[...], preferred_element_type=jnp.float32)
    h = _gelu(h + b_fc_ref[...], approx_gelu)
    out = jnp.dot(h.astype(jnp.bfloat16), w_proj_ref[...],
                  preferred_element_type=jnp.float32)
    # TODO(synk): training-mode dropout (p=config.summary_first_dropout) omitted;
    # eval-mode dropout is the identity, which is what is implemented.
    o_ref[...] = (out + b_proj_ref[...]).astype(o_ref.dtype)


def _mlp_kernel_blocked(x_ref, w_fc_ref, b_fc_ref, w_proj_ref, b_proj_ref,
                        o_ref, acc_ref, *, approx_gelu):
    """Intermediate-blocked variant: accumulate c_proj partials in f32 scratch."""
    j = pl.program_id(1)

    @pl.when(j == 0)
    def _():
        acc_ref[...] = jnp.zeros_like(acc_ref)

    h = jnp.dot(x_ref[...], w_fc_ref[...], preferred_element_type=jnp.float32)
    h = _gelu(h + b_fc_ref[...], approx_gelu)
    acc_ref[...] += jnp.dot(h.astype(jnp.bfloat16), w_proj_ref[...],
                            preferred_element_type=jnp.float32)

    @pl.when(j == pl.num_programs(1) - 1)
    def _():
        o_ref[...] = (acc_ref[...] + b_proj_ref[...]).astype(o_ref.dtype)


def _spec(shape, index_map, buffers=None):
    """BlockSpec with an optional pipeline-depth hint; falls back gracefully."""
    if buffers is not None:
        try:
            return pl.BlockSpec(shape, index_map, pipeline_mode=pl.Buffered(buffers))
        except Exception:
            pass
    return pl.BlockSpec(shape, index_map)


def gpt2_mlp(x, w_fc, b_fc, w_proj, b_proj, *, tile_m=256, tile_i=None,
             vmem_limit_bytes=None, approx_gelu=False):
    """Fused GPT-2 MLP forward.

    x:      [..., H]
    w_fc:   [H, I] (I = 4*H), b_fc:   [I] or [1, I]
    w_proj: [I, H],           b_proj: [H] or [1, H]
    tile_i: optionally force blocking of the intermediate dim (multiple of 128);
            by default the path and tile_i are picked from VMEM capacity.
    """
    orig_shape = x.shape
    H = orig_shape[-1]
    I = w_fc.shape[1]
    x2d = x.reshape(-1, H)
    T = x2d.shape[0]
    out_itemsize = jnp.dtype(x.dtype).itemsize

    # bf16 MXU operands; biases and accumulation stay f32.
    x_bf = x2d.astype(jnp.bfloat16)
    w_fc_bf = w_fc.astype(jnp.bfloat16)
    w_proj_bf = w_proj.astype(jnp.bfloat16)
    b_fc32 = b_fc.astype(jnp.float32).reshape(1, I)
    b_proj32 = b_proj.astype(jnp.float32).reshape(1, H)

    capacity = _vmem_capacity_bytes()
    budget = (capacity * 3) // 4  # headroom for Mosaic-internal scratch / spill

    # ---- choose path and tile sizes ----------------------------------------
    weight_resident = False
    tm = min(tile_m, _round_up(T, 16))
    ti = I
    if tile_i is None and _estimate_vmem_bytes(tm, I, H, out_itemsize, True) <= budget:
        # Weights stay resident in VMEM (single-buffered) across all row tiles.
        weight_resident = True
    else:
        # Streamed-weight path: bigger row tile keeps arithmetic intensity
        # (~tile_m FLOP per weight byte) above the v6e/v7x compute/memory knee.
        tm = min(max(tile_m, 512), _round_up(T, 16))
        if tile_i is not None:
            ti = tile_i
            assert I % ti == 0 and (ti == I or ti % 128 == 0), \
                "tile_i must divide I and be a multiple of 128"
        else:
            # Largest multiple-of-128 divisor of I that fits the VMEM budget.
            divisors = [d for d in range(I, 0, -128) if I % d == 0]
            ti = divisors[-1] if divisors else I
            for d in divisors:
                if _estimate_vmem_bytes(tm, d, H, out_itemsize, False) <= budget:
                    ti = d
                    break

    # Split the parallel row axis into >=2 tiles when affordable so both
    # TensorCores get work on v7x; don't drop the streamed path below the knee.
    if _cdiv(T, tm) < 2:
        tm_split = _round_up(max(8, _cdiv(T, 2)), 16)
        min_tm = 16 if weight_resident else 256
        if min_tm <= tm_split < tm:
            tm = tm_split

    t_pad = _round_up(T, tm)
    if t_pad != T:
        x_bf = jnp.pad(x_bf, ((0, t_pad - T), (0, 0)))

    if vmem_limit_bytes is None:
        # Derive the limit from the actual footprint (incl. fused GELU temp),
        # with margin, capped below physical VMEM for compiler headroom.
        est = _estimate_vmem_bytes(tm, ti, H, out_itemsize, weight_resident)
        vmem_limit_bytes = min(max(32 * _MIB, (est * 3) // 2 + 16 * _MIB),
                               capacity - 8 * _MIB)

    # ---- build and launch ----------------------------------------------------
    def _run(use_buffer_hints):
        b = (lambda n: n) if use_buffer_hints else (lambda n: None)
        if weight_resident:
            grid = (t_pad // tm,)
            in_specs = [
                _spec((tm, H), lambda i: (i, 0)),            # x row tile
                _spec((H, I), lambda i: (0, 0), b(1)),       # W_fc (resident, 1 buf)
                _spec((1, I), lambda i: (0, 0), b(1)),       # b_fc
                _spec((I, H), lambda i: (0, 0), b(1)),       # W_proj (resident, 1 buf)
                _spec((1, H), lambda i: (0, 0), b(1)),       # b_proj
            ]
            out_specs = pl.BlockSpec((tm, H), lambda i: (i, 0))
            scratch = []
            kernel = functools.partial(_mlp_kernel_resident, approx_gelu=approx_gelu)
            dim_sem = ("parallel",)
        else:
            grid = (t_pad // tm, I // ti)
            in_specs = [
                _spec((tm, H), lambda i, j: (i, 0)),          # x row tile
                _spec((H, ti), lambda i, j: (0, j), b(3)),    # W_fc slice (streamed, 3-deep)
                _spec((1, ti), lambda i, j: (0, j)),          # b_fc slice
                _spec((ti, H), lambda i, j: (j, 0), b(3)),    # W_proj slice (streamed, 3-deep)
                _spec((1, H), lambda i, j: (0, 0), b(1)),     # b_proj (constant, 1 buf)
            ]
            out_specs = pl.BlockSpec((tm, H), lambda i, j: (i, 0))
            scratch = [pltpu.VMEM((tm, H), jnp.float32)]      # c_proj accumulator
            kernel = functools.partial(_mlp_kernel_blocked, approx_gelu=approx_gelu)
            dim_sem = ("parallel", "arbitrary")

        return pl.pallas_call(
            kernel,
            out_shape=jax.ShapeDtypeStruct((t_pad, H), x.dtype),
            grid_spec=pltpu.PrefetchScalarGridSpec(
                num_scalar_prefetch=0,
                grid=grid,
                in_specs=in_specs,
                out_specs=out_specs,
                scratch_shapes=scratch,
            ),
            compiler_params=pltpu.CompilerParams(
                dimension_semantics=dim_sem,
                vmem_limit_bytes=vmem_limit_bytes,
            ),
        )(x_bf, w_fc_bf, b_fc32, w_proj_bf, b_proj32)

    try:
        out = _run(True)
    except Exception:
        # Compatibility fallback for Pallas builds that reject BlockSpec
        # pipeline_mode / these buffer counts; compute semantics are identical.
        out = _run(False)

    if t_pad != T:
        out = out[:T]
    return out.reshape(orig_shape)


def reference_mlp(x, w_fc, b_fc, w_proj, b_proj):
    xf = x.astype(jnp.float32)
    h = xf @ w_fc.astype(jnp.float32) + b_fc.astype(jnp.float32).reshape(1, -1)
    h = 0.5 * h * (1.0 + jax.lax.erf(h * jnp.float32(0.7071067811865476)))
    out = h @ w_proj.astype(jnp.float32) + b_proj.astype(jnp.float32).reshape(1, -1)
    return out.astype(x.dtype)


if __name__ == "__main__":
    # Small GPT-2-like config: n_embd=32 -> intermediate=128, batch=2, seq=8.
    B, S, H = 2, 8, 32
    I = 4 * H

    key = jax.random.PRNGKey(0)
    kx, k1, k2, k3, k4 = jax.random.split(key, 5)

    x = jax.random.normal(kx, (B, S, H), dtype=jnp.float32)
    w_fc = 0.02 * jax.random.normal(k1, (H, I), dtype=jnp.float32)
    b_fc = 0.02 * jax.random.normal(k2, (I,), dtype=jnp.float32)
    w_proj = 0.02 * jax.random.normal(k3, (I, H), dtype=jnp.float32)
    b_proj = 0.02 * jax.random.normal(k4, (H,), dtype=jnp.float32)

    ref = reference_mlp(x, w_fc, b_fc, w_proj, b_proj)

    # 1) Weight-resident fused path (default for shapes that fit VMEM).
    out = gpt2_mlp(x, w_fc, b_fc, w_proj, b_proj)
    jax.block_until_ready(out)
    assert jnp.allclose(out, ref, atol=2e-3, rtol=2e-2), "resident path mismatch"

    # 2) Intermediate-blocked (streamed-weight) path, exercised explicitly.
    out_blk = gpt2_mlp(x, w_fc, b_fc, w_proj, b_proj, tile_i=128)
    jax.block_until_ready(out_blk)
    assert jnp.allclose(out_blk, ref, atol=2e-3, rtol=2e-2), "blocked path mismatch"

    # 3) Blocked path with a real multi-step reduction over the intermediate dim
    #    (H=64 -> I=256, tile_i=128 -> two accumulation steps).
    H2 = 64
    I2 = 4 * H2
    key2 = jax.random.PRNGKey(1)
    kx2, k5, k6, k7, k8 = jax.random.split(key2, 5)
    x2 = jax.random.normal(kx2, (B, S, H2), dtype=jnp.float32)
    w_fc2 = 0.02 * jax.random.normal(k5, (H2, I2), dtype=jnp.float32)
    b_fc2 = 0.02 * jax.random.normal(k6, (I2,), dtype=jnp.float32)
    w_proj2 = 0.02 * jax.random.normal(k7, (I2, H2), dtype=jnp.float32)
    b_proj2 = 0.02 * jax.random.normal(k8, (H2,), dtype=jnp.float32)

    ref2 = reference_mlp(x2, w_fc2, b_fc2, w_proj2, b_proj2)
    out2 = gpt2_mlp(x2, w_fc2, b_fc2, w_proj2, b_proj2, tile_i=128)
    jax.block_until_ready(out2)
    assert jnp.allclose(out2, ref2, atol=2e-3, rtol=2e-2), "multi-step blocked mismatch"

    print("KERNEL_OK")
</pallas_src>

<mosaic_0001>
module attributes {stable_mosaic.version = 11 : i64} {
  func.func @_mlp_kernel_resident(%arg0: i32, %arg1: memref<16x32xbf16, #tpu.memory_space<vmem>>, %arg2: memref<32x128xbf16, #tpu.memory_space<vmem>>, %arg3: memref<1x128xf32, #tpu.memory_space<vmem>>, %arg4: memref<128x32xbf16, #tpu.memory_space<vmem>>, %arg5: memref<1x32xf32, #tpu.memory_space<vmem>>, %arg6: memref<16x32xf32, #tpu.memory_space<vmem>>) attributes {dimension_semantics = [#tpu.dimension_semantics<parallel>], iteration_bounds = array<i64: 1>, scalar_prefetch = 0 : i64, scratch_operands = 0 : i64, tpu.core_type = #tpu.core_type<tc>, window_params = [{transform_indices = @transform_0, window_bounds = array<i64: 16, 32>}, {pipeline_mode = #tpu.pipeline_mode<synchronous>, transform_indices = @transform_1, window_bounds = array<i64: 32, 128>}, {pipeline_mode = #tpu.pipeline_mode<synchronous>, transform_indices = @transform_2, window_bounds = array<i64: 1, 128>}, {pipeline_mode = #tpu.pipeline_mode<synchronous>, transform_indices = @transform_3, window_bounds = array<i64: 128, 32>}, {pipeline_mode = #tpu.pipeline_mode<synchronous>, transform_indices = @transform_4, window_bounds = array<i64: 1, 32>}, {transform_indices = @transform_5, window_bounds = array<i64: 16, 32>}]} {
    %c0 = arith.constant 0 : index
    %c0_0 = arith.constant 0 : index
    %0 = vector.load %arg1[%c0, %c0_0] : memref<16x32xbf16, #tpu.memory_space<vmem>>, vector<16x32xbf16>
    %c0_1 = arith.constant 0 : index
    %c0_2 = arith.constant 0 : index
    %1 = vector.load %arg2[%c0_1, %c0_2] : memref<32x128xbf16, #tpu.memory_space<vmem>>, vector<32x128xbf16>
    %cst = arith.constant dense<0.000000e+00> : vector<16x128xf32>
    %2 = tpu.matmul %0, %1, %cst {dimension_numbers = #tpu.dot_dimension_numbers<[1], [0], [0], [1], [0, 0, 1, 1], [], []>} : vector<16x32xbf16>, vector<32x128xbf16>, vector<16x128xf32> -> vector<16x128xf32>
    %c0_3 = arith.constant 0 : index
    %c0_4 = arith.constant 0 : index
    %3 = vector.load %arg3[%c0_3, %c0_4] : memref<1x128xf32, #tpu.memory_space<vmem>>, vector<1x128xf32>
    %4 = vector.broadcast %3 : vector<1x128xf32> to vector<16x128xf32>
    %5 = arith.addf %2, %4 : vector<16x128xf32>
    %cst_5 = arith.constant 5.000000e-01 : f32
    %6 = vector.broadcast %cst_5 : f32 to vector<16x128xf32>
    %7 = arith.mulf %6, %5 : vector<16x128xf32>
    %cst_6 = arith.constant 0.707106769 : f32
    %8 = vector.broadcast %cst_6 : f32 to vector<16x128xf32>
    %9 = arith.mulf %5, %8 : vector<16x128xf32>
    %10 = math.erf %9 : vector<16x128xf32>
    %cst_7 = arith.constant 1.000000e+00 : f32
    %11 = vector.broadcast %cst_7 : f32 to vector<16x128xf32>
    %12 = arith.addf %11, %10 : vector<16x128xf32>
    %13 = arith.mulf %7, %12 : vector<16x128xf32>
    %14 = arith.truncf %13 : vector<16x128xf32> to vector<16x128xbf16>
    %c0_8 = arith.constant 0 : index
    %c0_9 = arith.constant 0 : index
    %15 = vector.load %arg4[%c0_8, %c0_9] : memref<128x32xbf16, #tpu.memory_space<vmem>>, vector<128x32xbf16>
    %cst_10 = arith.constant dense<0.000000e+00> : vector<16x32xf32>
    %16 = tpu.matmul %14, %15, %cst_10 {dimension_numbers = #tpu.dot_dimension_numbers<[1], [0], [0], [1], [0, 0, 1, 1], [], []>} : vector<16x128xbf16>, vector<128x32xbf16>, vector<16x32xf32> -> vector<16x32xf32>
    %c0_11 = arith.constant 0 : index
    %c0_12 = arith.constant 0 : index
    %17 = vector.load %arg5[%c0_11, %c0_12] : memref<1x32xf32, #tpu.memory_space<vmem>>, vector<1x32xf32>
    %18 = vector.broadcast %17 : vector<1x32xf32> to vector<16x32xf32>
    %19 = arith.addf %16, %18 : vector<16x32xf32>
    %c0_13 = arith.constant 0 : index
    %c0_14 = arith.constant 0 : index
    %20 = vector.load %arg6[%c0_13, %c0_14] : memref<16x32xf32, #tpu.memory_space<vmem>>, vector<16x32xf32>
    tpu.vector_store %arg6[%c0_13, %c0_14], %19 {strides = array<i32>} : memref<16x32xf32, #tpu.memory_space<vmem>>, vector<16x32xf32>,
    return
  }
  func.func @transform_0(%arg0: i32) -> (i32, i32) {
    %c0_i32 = arith.constant 0 : i32
    %c0_i32_0 = arith.constant 0 : i32
    return %arg0, %c0_i32 : i32, i32
  }
  func.func @transform_1(%arg0: i32) -> (i32, i32) {
    %c0_i32 = arith.constant 0 : i32
    %c0_i32_0 = arith.constant 0 : i32
    %c0_i32_1 = arith.constant 0 : i32
    return %c0_i32, %c0_i32_0 : i32, i32
  }
  func.func @transform_2(%arg0: i32) -> (i32, i32) {
    %c0_i32 = arith.constant 0 : i32
    %c0_i32_0 = arith.constant 0 : i32
    %c0_i32_1 = arith.constant 0 : i32
    return %c0_i32, %c0_i32_0 : i32, i32
  }
  func.func @transform_3(%arg0: i32) -> (i32, i32) {
    %c0_i32 = arith.constant 0 : i32
    %c0_i32_0 = arith.constant 0 : i32
    %c0_i32_1 = arith.constant 0 : i32
    return %c0_i32, %c0_i32_0 : i32, i32
  }
  func.func @transform_4(%arg0: i32) -> (i32, i32) {
    %c0_i32 = arith.constant 0 : i32
    %c0_i32_0 = arith.constant 0 : i32
    %c0_i32_1 = arith.constant 0 : i32
    return %c0_i32, %c0_i32_0 : i32, i32
  }
  func.func @transform_5(%arg0: i32) -> (i32, i32) {
    %c0_i32 = arith.constant 0 : i32
    %c0_i32_0 = arith.constant 0 : i32
    return %arg0, %c0_i32 : i32, i32
  }
}

module attributes {stable_mosaic.version = 11 : i64} {
  func.func @_mlp_kernel_resident(%arg0: i32, %arg1: memref<16x32xbf16, #tpu.memory_space<vmem>>, %arg2: memref<32x128xbf16, #tpu.memory_space<vmem>>, %arg3: memref<1x128xf32, #tpu.memory_space<vmem>>, %arg4: memref<128x32xbf16, #tpu.memory_space<vmem>>, %arg5: memref<1x32xf32, #tpu.memory_space<vmem>>, %arg6: memref<16x32xf32, #tpu.memory_space<vmem>>) attributes {dimension_semantics = [#tpu.dimension_semantics<parallel>], iteration_bounds = array<i64: 1>, scalar_prefetch = 0 : i64, scratch_operands = 0 : i64, tpu.core_type = #tpu.core_type<tc>, window_params = [{transform_indices = @transform_0, window_bounds = array<i64: 16, 32>}, {pipeline_mode = #tpu.pipeline_mode<synchronous>, transform_indices = @transform_1, window_bounds = array<i64: 32, 128>}, {pipeline_mode = #tpu.pipeline_mode<synchronous>, transform_indices = @transform_2, window_bounds = array<i64: 1, 128>}, {pipeline_mode = #tpu.pipeline_mode<synchronous>, transform_indices = @transform_3, window_bounds = array<i64: 128, 32>}, {pipeline_mode = #tpu.pipeline_mode<synchronous>, transform_indices = @transform_4, window_bounds = array<i64: 1, 32>}, {transform_indices = @transform_5, window_bounds = array<i64: 16, 32>}]} {
    %c0 = arith.constant 0 : index
    %c0_0 = arith.constant 0 : index
    %0 = vector.load %arg1[%c0, %c0_0] : memref<16x32xbf16, #tpu.memory_space<vmem>>, vector<16x32xbf16>
    %c0_1 = arith.constant 0 : index
    %c0_2 = arith.constant 0 : index
    %1 = vector.load %arg2[%c0_1, %c0_2] : memref<32x128xbf16, #tpu.memory_space<vmem>>, vector<32x128xbf16>
    %cst = arith.constant dense<0.000000e+00> : vector<16x128xf32>
    %2 = tpu.matmul %0, %1, %cst {dimension_numbers = #tpu.dot_dimension_numbers<[1], [0], [0], [1], [0, 0, 1, 1], [], []>} : vector<16x32xbf16>, vector<32x128xbf16>, vector<16x128xf32> -> vector<16x128xf32>
    %c0_3 = arith.constant 0 : index
    %c0_4 = arith.constant 0 : index
    %3 = vector.load %arg3[%c0_3, %c0_4] : memref<1x128xf32, #tpu.memory_space<vmem>>, vector<1x128xf32>
    %4 = vector.broadcast %3 : vector<1x128xf32> to vector<16x128xf32>
    %5 = arith.addf %2, %4 : vector<16x128xf32>
    %cst_5 = arith.constant 5.000000e-01 : f32
    %6 = vector.broadcast %cst_5 : f32 to vector<16x128xf32>
    %7 = arith.mulf %6, %5 : vector<16x128xf32>
    %cst_6 = arith.constant 0.707106769 : f32
    %8 = vector.broadcast %cst_6 : f32 to vector<16x128xf32>
    %9 = arith.mulf %5, %8 : vector<16x128xf32>
    %10 = math.erf %9 : vector<16x128xf32>
    %cst_7 = arith.constant 1.000000e+00 : f32
    %11 = vector.broadcast %cst_7 : f32 to vector<16x128xf32>
    %12 = arith.addf %11, %10 : vector<16x128xf32>
    %13 = arith.mulf %7, %12 : vector<16x128xf32>
    %14 = arith.truncf %13 : vector<16x128xf32> to vector<16x128xbf16>
    %c0_8 = arith.constant 0 : index
    %c0_9 = arith.constant 0 : index
    %15 = vector.load %arg4[%c0_8, %c0_9] : memref<128x32xbf16, #tpu.memory_space<vmem>>, vector<128x32xbf16>
    %cst_10 = arith.constant dense<0.000000e+00> : vector<16x32xf32>
    %16 = tpu.matmul %14, %15, %cst_10 {dimension_numbers = #tpu.dot_dimension_numbers<[1], [0], [0], [1], [0, 0, 1, 1], [], []>} : vector<16x128xbf16>, vector<128x32xbf16>, vector<16x32xf32> -> vector<16x32xf32>
    %c0_11 = arith.constant 0 : index
    %c0_12 = arith.constant 0 : index
    %17 = vector.load %arg5[%c0_11, %c0_12] : memref<1x32xf32, #tpu.memory_space<vmem>>, vector<1x32xf32>
    %18 = vector.broadcast %17 : vector<1x32xf32> to vector<16x32xf32>
    %19 = arith.addf %16, %18 : vector<16x32xf32>
    %c0_13 = arith.constant 0 : index
    %c0_14 = arith.constant 0 : index
    %20 = vector.load %arg6[%c0_13, %c0_14] : memref<16x32xf32, #tpu.memory_space<vmem>>, vector<16x32xf32>
    tpu.vector_store %arg6[%c0_13, %c0_14], %19 {strides = array<i32>} : memref<16x32xf32, #tpu.memory_space<vmem>>, vector<16x32xf32>,
    return
  }
  func.func @transform_0(%arg0: i32) -> (i32, i32) {
    %c0_i32 = arith.constant 0 : i32
    %c0_i32_0 = arith.constant 0 : i32
    return %arg0, %c0_i32 : i32, i32
  }
  func.func @transform_1(%arg0: i32) -> (i32, i32) {
    %c0_i32 = arith.constant 0 : i32
    %c0_i32_0 = arith.constant 0 : i32
    %c0_i32_1 = arith.constant 0 : i32
    return %c0_i32, %c0_i32_0 : i32, i32
  }
  func.func @transform_2(%arg0: i32) -> (i32, i32) {
    %c0_i32 = arith.constant 0 : i32
    %c0_i32_0 = arith.constant 0 : i32
    %c0_i32_1 = arith.constant 0 : i32
    return %c0_i32, %c0_i32_0 : i32, i32
  }
  func.func @transform_3(%arg0: i32) -> (i32, i32) {
    %c0_i32 = arith.constant 0 : i32
    %c0_i32_0 = arith.constant 0 : i32
    %c0_i32_1 = arith.constant 0 : i32
    return %c0_i32, %c0_i32_0 : i32, i32
  }
  func.func @transform_4(%arg0: i32) -> (i32, i32) {
    %c0_i32 = arith.constant 0 : i32
    %c0_i32_0 = arith.constant 0 : i32
    %c0_i32_1 = arith.constant 0 : i32
    return %c0_i32, %c0_i32_0 : i32, i32
  }
  func.func @transform_5(%arg0: i32) -> (i32, i32) {
    %c0_i32 = arith.constant 0 : i32
    %c0_i32_0 = arith.constant 0 : i32
    return %arg0, %c0_i32 : i32, i32
  }
}

</mosaic_0001>

<bundles_post_ra>
// kernel: tpu_custom_call.1
= control target key start
LH: loop header
LB: loop body
LE: loop exit
PB: predicated region body
PF: predicated region fallthrough
CT: control target
= control target key end

     0   :  { %s447_s0 = inlined_call_operand.vmem [shape: bf16[16,32], index: 0, kind: input, shape index: {}]   ;;  %s448_s1 = inlined_call_operand.vmem [shape: bf16[32,128], index: 1, kind: input, shape index: {}]   ;;  %s449_s2 = inlined_call_operand.vmem [shape: f32[1,128], index: 2, kind: input, shape index: {}]   ;;  %s450_s3 = inlined_call_operand.vmem [shape: bf16[128,32], index: 3, kind: input, shape index: {}]   ;;  %s451_s4 = inlined_call_operand.vmem [shape: f32[1,32], index: 4, kind: input, shape index: {}]   ;;  %s452_s5 = inlined_call_operand.hbm [shape: f32[16,32], index: 5, kind: output, shape index: {}]  }
   0x1   :  { %v307_v0 = vld [vmem:[%s448_s1 + $0x8] sm:$0xff]  ;;  %v306_v1 = vld [vmem:[%s448_s1] sm:$0xff] }
   0x2   :  { %59 = vmatpush.bf16.msra.mxu0 %v307_v0 }
   0x3   :  { %10 = vsyncpa [#allocation3], 0  ;;  %v305_v2 = vld [vmem:[%s447_s0] sm:$0xff]  ;;  %vm49_vm0 = vcmask 261120   ;;  %v315_v4 = vld [vmem:[%s450_s3 + $0x38] sm:$0xff]  ;;  %s351_s15 = smov [#allocation2]  }
   0x4   :  { %v319_v3 = vld [vmem:[%s449_s2] ss:$0 sm:$0xff]  ;;  %224 = vmatpush.bf16.msra.mxu1 %v315_v4  ;;  %v314_v8 = vld [vmem:[%s450_s3 + $0x30] sm:$0xff]  ;;  %v313_v10 = vld [vmem:[%s450_s3 + $0x28] sm:$0xff]  ;;  %s244_s16 = sshll.u32 %s351_s15, 4  ;;  %s246_s19 = sshll.u32 %s452_s5, 4  ;;  %s245_s16 = int_to_ptr.vmem [resolvable:$true] %s244_s16  ;;  %s247_s19 = int_to_ptr.hbm [resolvable:$true] %s246_s19 }
   0x5   :  { %v312_v15 = vld [vmem:[%s450_s3 + $0x20] sm:$0xff]  ;;  %v311_v21 = vld [vmem:[%s450_s3 + $0x18] sm:$0xff]  ;;  %v310_v27 = vld [vmem:[%s450_s3 + $0x10] sm:$0xff]  ;;  %s352_s20 = smov 128   ;;  %s353_s21 = smov 8  }
   0x6   :  { %60 = vmatpush.bf16.msra.mxu0 %v306_v1  ;;  %v309_v35 = vld [vmem:[%s450_s3 + $0x8] sm:$0xff]  ;;  %v308_v42 = vld [vmem:[%s450_s3] sm:$0xff] }
   0x8   :  { %225 = vmatpush.bf16.msra.mxu1 %v314_v8 }
   0x9   :  { %270 = vmatmul.msk.bf16.vlgmr.msra.gmra.mxu0 %vm49_vm0, %v305_v2 }
   0xc   :  { %226 = vmatpush.bf16.msra.mxu1 %v313_v10 }
  0x10   :  { %227 = vmatpush.bf16.msra.mxu1 %v312_v15 }
  0x14   :  { %228 = vmatpush.bf16.msra.mxu1 %v311_v21 }
  0x18   :  { %229 = vmatpush.bf16.msra.mxu1 %v310_v27 }
  0x1c   :  { %230 = vmatpush.bf16.msra.mxu1 %v309_v35 }
  0x20   :  { %231 = vmatpush.bf16.msra.mxu1 %v308_v42 }
  0x86   :  { %v62_v5 = vpop.f32.mrf.mxu0 }
  0x87   :  { %v400_v6 = vadd.f32 %v319_v3, %v62_v5 }
  0x89   :  { %v403_v7 = vmul.f32 0.70710677, %v400_v6 }
  0x8b   :  { %v71_v9 = vmul.f32 %v403_v7, %v403_v7 }
  0x8d   :  { %v72_v11 = vmin.f32 %v71_v9, 16.0 }
  0x8e   :  { %v64_v12 = vpop.f32.mrf.mxu0 }
  0x8f   :  { %v73_v13 = vmul.f32 2.1237322e-06, %v72_v11  ;;  %v413_v14 = vadd.f32 %v319_v3, %v64_v12  ;;  %v84_v16 = vmul.f32 3.8918573e-05, %v72_v11 }
  0x91   :  { %v74_v17 = vadd.f32 0.00028619796, %v73_v13  ;;  %v419_v18 = vmul.f32 0.70710677, %v413_v14  ;;  %v85_v19 = vadd.f32 0.001143296, %v84_v16 }
  0x93   :  { %v111_v20 = vmul.f32 %v419_v18, %v419_v18  ;;  %v75_v22 = vmul.f32 %v74_v17, %v72_v11  ;;  %v86_v23 = vmul.f32 %v85_v19, %v72_v11 }
  0x95   :  { %v112_v24 = vmin.f32 %v111_v20, 16.0  ;;  %v87_v25 = vadd.f32 0.014752088, %v86_v23  ;;  %v76_v29 = vadd.f32 0.0036580483, %v75_v22 }
  0x97   :  { %v113_v26 = vmul.f32 2.1237322e-06, %v112_v24  ;;  %v124_v28 = vmul.f32 3.8918573e-05, %v112_v24  ;;  %v88_v30 = vmul.f32 %v87_v25, %v72_v11  ;;  %v77_v37 = vmul.f32 %v76_v29, %v72_v11 }
  0x98   :  { %v68_v29 = vmul.f32 0.5, %v413_v14 }
  0x99   :  { %v114_v31 = vadd.f32 0.00028619796, %v113_v26  ;;  %v125_v32 = vadd.f32 0.001143296, %v124_v28  ;;  %v89_v33 = vadd.f32 0.112945676, %v88_v30 }
  0x9a   :  { %v78_v44 = vadd.f32 0.05243302, %v77_v37  ;;  %v67_v28 = vmul.f32 0.5, %v400_v6 }
  0x9b   :  { %v115_v34 = vmul.f32 %v114_v31, %v112_v24  ;;  %v126_v36 = vmul.f32 %v125_v32, %v112_v24  ;;  %v90_v38 = vmul.f32 %v89_v33, %v72_v11 }
  0x9c   :  { %v79_v50 = vmul.f32 %v78_v44, %v72_v11 }
  0x9d   :  { %v116_v39 = vadd.f32 0.0036580483, %v115_v34  ;;  %v127_v40 = vadd.f32 0.014752088, %v126_v36  ;;  %v91_v41 = vadd.f32 0.4994258, %v90_v38 }
  0x9e   :  { %v80_v54 = vadd.f32 0.18741608, %v79_v50 }
  0x9f   :  { %v128_v43 = vmul.f32 %v127_v40, %v112_v24  ;;  %v92_v45 = vmul.f32 %v91_v41, %v72_v11  ;;  %v117_v46 = vmul.f32 %v116_v39, %v112_v24 }
  0xa0   :  { %v81_v59 = vmul.f32 %v80_v54, %v72_v11 }
  0xa1   :  { %v129_v47 = vadd.f32 0.112945676, %v128_v43  ;;  %v93_v48 = vadd.f32 1.0, %v92_v45  ;;  %v118_v51 = vadd.f32 0.05243302, %v117_v46 }
  0xa2   :  { %v82_v1 = vadd.f32 1.1283791, %v81_v59 }
  0xa3   :  { %v130_v49 = vmul.f32 %v129_v47, %v112_v24  ;;  %321 = vrcp.f32 %v93_v48  ;;  %v119_v55 = vmul.f32 %v118_v51, %v112_v24  ;;  %v105_v62 = vand.u32 2147483648, %v93_v48 }
  0xa4   :  { %v103_v0 = vand.u32 2147483647, %v93_v48  ;;  %vm99_vm2 = vweird.f32 %v93_v48  ;;  %v83_v10 = vmul.f32 %v82_v1, %v403_v7 }
  0xa5   :  { %v131_v52 = vadd.f32 0.4994258, %v130_v49  ;;  %v120_v60 = vadd.f32 0.18741608, %v119_v55  ;;  %v106_v5 = vor.u32 1.1754944e-38, %v105_v62 }
  0xa6   :  { %vm104_vm4 = vcmp.eq.f32.partialorder %v103_v0, 8.507059e+37 }
  0xa7   :  { %v132_v53 = vmul.f32 %v131_v52, %v112_v24  ;;  %v121_v3 = vmul.f32 %v120_v60, %v112_v24 }
  0xa9   :  { %v133_v56 = vadd.f32 1.0, %v132_v53  ;;  %v322_v57 = vpop.eup %321  ;;  %v122_v13 = vadd.f32 1.1283791, %v121_v3 }
  0xaa   :  { %v95_v58 = vmul.f32 %v322_v57, %v93_v48  ;;  %vm100_vm1 = vweird.f32 %v322_v57 }
  0xab   :  { %323 = vrcp.f32 %v133_v56  ;;  %vm101_vm3 = vmor %vm99_vm2, %vm100_vm1  ;;  %v145_v15 = vand.u32 2147483648, %v133_v56  ;;  %v143_v19 = vand.u32 2147483647, %v133_v56  ;;  %vm139_vm6 = vweird.f32 %v133_v56 }
  0xac   :  { %v96_v61 = vsub.f32 1.0, %v95_v58  ;;  %v123_v22 = vmul.f32 %v122_v13, %v419_v18  ;;  %v320_v18 = vld [vmem:[%s451_s4] ss:$0 sm:$0xff] }
  0xad   :  { %v146_v21 = vor.u32 1.1754944e-38, %v145_v15  ;;  %vm144_vm8 = vcmp.eq.f32.partialorder %v143_v19, 8.507059e+37 }
  0xae   :  { %v97_v63 = vmul.f32 %v322_v57, %v96_v61 }
  0xb0   :  { %v98_v4 = vadd.f32 %v322_v57, %v97_v63 }
  0xb1   :  { %v324_v2 = vpop.eup %323 }
  0xb2   :  { %v135_v8 = vmul.f32 %v324_v2, %v133_v56  ;;  %v102_v9 = vsel %vm101_vm3, %v322_v57, %v98_v4  ;;  %vm140_vm5 = vweird.f32 %v324_v2 }
  0xb3   :  { %v107_v12 = vsel %vm104_vm4, %v106_v5, %v102_v9  ;;  %vm141_vm7 = vmor %vm139_vm6, %vm140_vm5 }
  0xb4   :  { %v136_v11 = vsub.f32 1.0, %v135_v8  ;;  %v108_v16 = vmul.f32 %v107_v12, %v83_v10 }
  0xb6   :  { %v137_v17 = vmul.f32 %v324_v2, %v136_v11  ;;  %v271_v23 = vclamps-f32 %v108_v16, 1.0 }
  0xb8   :  { %v138_v20 = vadd.f32 %v324_v2, %v137_v17  ;;  %v151_v27 = vadd.f32 1.0, %v271_v23 }
  0xba   :  { %v142_v24 = vsel %vm141_vm7, %v324_v2, %v138_v20  ;;  %v153_v31 = vmul.f32 %v151_v27, %v67_v28 }
  0xbb   :  { %v147_v25 = vsel %vm144_vm8, %v146_v21, %v142_v24 }
  0xbc   :  { %v148_v26 = vmul.f32 %v147_v25, %v123_v22 }
  0xbe   :  { %v272_v7 = vclamps-f32 %v148_v26, 1.0 }
  0xc0   :  { %v152_v30 = vadd.f32 1.0, %v272_v7 }
  0xc2   :  { %v154_v32 = vmul.f32 %v152_v30, %v68_v29 }
  0xc4   :  { %v155_v33 = vpack.c.bf16 %v154_v32, %v153_v31 }
  0xc6   :  { %232 = vmatmul.bf16.vlgmr.msra.gmra.mxu1 %v155_v33 }
 0x143   :  { %v233_v34 = vpop.f32.mrf.mxu1 }
 0x144   :  { %v234_v35 = vadd.f32 %v320_v18, %v233_v34 }
 0x146   :  { %238 = vst.msk [vmem:[#allocation2] sm:$0xff] %vm49_vm0, %v234_v35 }
 0x14b   :  { %v235_v6 = vpop.f32.mrf.mxu1 }
 0x14c   :  { %v236_v14 = vadd.f32 %v320_v18, %v235_v6 }
 0x14e   :  { %239 = vst.msk [vmem:[#allocation2 + $0x8] sm:$0xff] %vm49_vm0, %v236_v14 }
 0x14f   :  { %252 = dma.vmem_to_hbm [thread:$0]  %s245_s16, 256, %s247_s19, [#allocation3], %s352_s20, %s352_s20, %s353_s21  }
 0x150   :  { %349 = dma.done.wait [#allocation3], 256  }
 0x151   :  { %350 = vsyncadd [#allocation3], 4294967040 }
 0x152   :  { %257 = vsyncpa [#allocation3], 1 }

// kernel: tpu_custom_call.1
= control target key start
LH: loop header
LB: loop body
LE: loop exit
PB: predicated region body
PF: predicated region fallthrough
CT: control target
= control target key end

     0   :  { %s447_s0 = inlined_call_operand.vmem [shape: bf16[16,32], index: 0, kind: input, shape index: {}]   ;;  %s448_s1 = inlined_call_operand.vmem [shape: bf16[32,128], index: 1, kind: input, shape index: {}]   ;;  %s449_s2 = inlined_call_operand.vmem [shape: f32[1,128], index: 2, kind: input, shape index: {}]   ;;  %s450_s3 = inlined_call_operand.vmem [shape: bf16[128,32], index: 3, kind: input, shape index: {}]   ;;  %s451_s4 = inlined_call_operand.vmem [shape: f32[1,32], index: 4, kind: input, shape index: {}]   ;;  %s452_s5 = inlined_call_operand.hbm [shape: f32[16,32], index: 5, kind: output, shape index: {}]  }
   0x1   :  { %v307_v0 = vld [vmem:[%s448_s1 + $0x8] sm:$0xff]  ;;  %v306_v1 = vld [vmem:[%s448_s1] sm:$0xff] }
   0x2   :  { %59 = vmatpush.bf16.msra.mxu0 %v307_v0 }
   0x3   :  { %10 = vsyncpa [#allocation3], 0  ;;  %v305_v2 = vld [vmem:[%s447_s0] sm:$0xff]  ;;  %vm49_vm0 = vcmask 261120   ;;  %v315_v4 = vld [vmem:[%s450_s3 + $0x38] sm:$0xff]  ;;  %s351_s15 = smov [#allocation2]  }
   0x4   :  { %v319_v3 = vld [vmem:[%s449_s2] ss:$0 sm:$0xff]  ;;  %224 = vmatpush.bf16.msra.mxu1 %v315_v4  ;;  %v314_v8 = vld [vmem:[%s450_s3 + $0x30] sm:$0xff]  ;;  %v313_v10 = vld [vmem:[%s450_s3 + $0x28] sm:$0xff]  ;;  %s244_s16 = sshll.u32 %s351_s15, 4  ;;  %s246_s19 = sshll.u32 %s452_s5, 4  ;;  %s245_s16 = int_to_ptr.vmem [resolvable:$true] %s244_s16  ;;  %s247_s19 = int_to_ptr.hbm [resolvable:$true] %s246_s19 }
   0x5   :  { %v312_v15 = vld [vmem:[%s450_s3 + $0x20] sm:$0xff]  ;;  %v311_v21 = vld [vmem:[%s450_s3 + $0x18] sm:$0xff]  ;;  %v310_v27 = vld [vmem:[%s450_s3 + $0x10] sm:$0xff]  ;;  %s352_s20 = smov 128   ;;  %s353_s21 = smov 8  }
   0x6   :  { %60 = vmatpush.bf16.msra.mxu0 %v306_v1  ;;  %v309_v35 = vld [vmem:[%s450_s3 + $0x8] sm:$0xff]  ;;  %v308_v42 = vld [vmem:[%s450_s3] sm:$0xff] }
   0x8   :  { %225 = vmatpush.bf16.msra.mxu1 %v314_v8 }
   0x9   :  { %270 = vmatmul.msk.bf16.vlgmr.msra.gmra.mxu0 %vm49_vm0, %v305_v2 }
   0xc   :  { %226 = vmatpush.bf16.msra.mxu1 %v313_v10 }
  0x10   :  { %227 = vmatpush.bf16.msra.mxu1 %v312_v15 }
  0x14   :  { %228 = vmatpush.bf16.msra.mxu1 %v311_v21 }
  0x18   :  { %229 = vmatpush.bf16.msra.mxu1 %v310_v27 }
  0x1c   :  { %230 = vmatpush.bf16.msra.mxu1 %v309_v35 }
  0x20   :  { %231 = vmatpush.bf16.msra.mxu1 %v308_v42 }
  0x86   :  { %v62_v5 = vpop.f32.mrf.mxu0 }
  0x87   :  { %v400_v6 = vadd.f32 %v319_v3, %v62_v5 }
  0x89   :  { %v403_v7 = vmul.f32 0.70710677, %v400_v6 }
  0x8b   :  { %v71_v9 = vmul.f32 %v403_v7, %v403_v7 }
  0x8d   :  { %v72_v11 = vmin.f32 %v71_v9, 16.0 }
  0x8e   :  { %v64_v12 = vpop.f32.mrf.mxu0 }
  0x8f   :  { %v73_v13 = vmul.f32 2.1237322e-06, %v72_v11  ;;  %v413_v14 = vadd.f32 %v319_v3, %v64_v12  ;;  %v84_v16 = vmul.f32 3.8918573e-05, %v72_v11 }
  0x91   :  { %v74_v17 = vadd.f32 0.00028619796, %v73_v13  ;;  %v419_v18 = vmul.f32 0.70710677, %v413_v14  ;;  %v85_v19 = vadd.f32 0.001143296, %v84_v16 }
  0x93   :  { %v111_v20 = vmul.f32 %v419_v18, %v419_v18  ;;  %v75_v22 = vmul.f32 %v74_v17, %v72_v11  ;;  %v86_v23 = vmul.f32 %v85_v19, %v72_v11 }
  0x95   :  { %v112_v24 = vmin.f32 %v111_v20, 16.0  ;;  %v87_v25 = vadd.f32 0.014752088, %v86_v23  ;;  %v76_v29 = vadd.f32 0.0036580483, %v75_v22 }
  0x97   :  { %v113_v26 = vmul.f32 2.1237322e-06, %v112_v24  ;;  %v124_v28 = vmul.f32 3.8918573e-05, %v112_v24  ;;  %v88_v30 = vmul.f32 %v87_v25, %v72_v11  ;;  %v77_v37 = vmul.f32 %v76_v29, %v72_v11 }
  0x98   :  { %v68_v29 = vmul.f32 0.5, %v413_v14 }
  0x99   :  { %v114_v31 = vadd.f32 0.00028619796, %v113_v26  ;;  %v125_v32 = vadd.f32 0.001143296, %v124_v28  ;;  %v89_v33 = vadd.f32 0.112945676, %v88_v30 }
  0x9a   :  { %v78_v44 = vadd.f32 0.05243302, %v77_v37  ;;  %v67_v28 = vmul.f32 0.5, %v400_v6 }
  0x9b   :  { %v115_v34 = vmul.f32 %v114_v31, %v112_v24  ;;  %v126_v36 = vmul.f32 %v125_v32, %v112_v24  ;;  %v90_v38 = vmul.f32 %v89_v33, %v72_v11 }
  0x9c   :  { %v79_v50 = vmul.f32 %v78_v44, %v72_v11 }
  0x9d   :  { %v116_v39 = vadd.f32 0.0036580483, %v115_v34  ;;  %v127_v40 = vadd.f32 0.014752088, %v126_v36  ;;  %v91_v41 = vadd.f32 0.4994258, %v90_v38 }
  0x9e   :  { %v80_v54 = vadd.f32 0.18741608, %v79_v50 }
  0x9f   :  { %v128_v43 = vmul.f32 %v127_v40, %v112_v24  ;;  %v92_v45 = vmul.f32 %v91_v41, %v72_v11  ;;  %v117_v46 = vmul.f32 %v116_v39, %v112_v24 }
  0xa0   :  { %v81_v59 = vmul.f32 %v80_v54, %v72_v11 }
  0xa1   :  { %v129_v47 = vadd.f32 0.112945676, %v128_v43  ;;  %v93_v48 = vadd.f32 1.0, %v92_v45  ;;  %v118_v51 = vadd.f32 0.05243302, %v117_v46 }
  0xa2   :  { %v82_v1 = vadd.f32 1.1283791, %v81_v59 }
  0xa3   :  { %v130_v49 = vmul.f32 %v129_v47, %v112_v24  ;;  %321 = vrcp.f32 %v93_v48  ;;  %v119_v55 = vmul.f32 %v118_v51, %v112_v24  ;;  %v105_v62 = vand.u32 2147483648, %v93_v48 }
  0xa4   :  { %v103_v0 = vand.u32 2147483647, %v93_v48  ;;  %vm99_vm2 = vweird.f32 %v93_v48  ;;  %v83_v10 = vmul.f32 %v82_v1, %v403_v7 }
  0xa5   :  { %v131_v52 = vadd.f32 0.4994258, %v130_v49  ;;  %v120_v60 = vadd.f32 0.18741608, %v119_v55  ;;  %v106_v5 = vor.u32 1.1754944e-38, %v105_v62 }
  0xa6   :  { %vm104_vm4 = vcmp.eq.f32.partialorder %v103_v0, 8.507059e+37 }
  0xa7   :  { %v132_v53 = vmul.f32 %v131_v52, %v112_v24  ;;  %v121_v3 = vmul.f32 %v120_v60, %v112_v24 }
  0xa9   :  { %v133_v56 = vadd.f32 1.0, %v132_v53  ;;  %v322_v57 = vpop.eup %321  ;;  %v122_v13 = vadd.f32 1.1283791, %v121_v3 }
  0xaa   :  { %v95_v58 = vmul.f32 %v322_v57, %v93_v48  ;;  %vm100_vm1 = vweird.f32 %v322_v57 }
  0xab   :  { %323 = vrcp.f32 %v133_v56  ;;  %vm101_vm3 = vmor %vm99_vm2, %vm100_vm1  ;;  %v145_v15 = vand.u32 2147483648, %v133_v56  ;;  %v143_v19 = vand.u32 2147483647, %v133_v56  ;;  %vm139_vm6 = vweird.f32 %v133_v56 }
  0xac   :  { %v96_v61 = vsub.f32 1.0, %v95_v58  ;;  %v123_v22 = vmul.f32 %v122_v13, %v419_v18  ;;  %v320_v18 = vld [vmem:[%s451_s4] ss:$0 sm:$0xff] }
  0xad   :  { %v146_v21 = vor.u32 1.1754944e-38, %v145_v15  ;;  %vm144_vm8 = vcmp.eq.f32.partialorder %v143_v19, 8.507059e+37 }
  0xae   :  { %v97_v63 = vmul.f32 %v322_v57, %v96_v61 }
  0xb0   :  { %v98_v4 = vadd.f32 %v322_v57, %v97_v63 }
  0xb1   :  { %v324_v2 = vpop.eup %323 }
  0xb2   :  { %v135_v8 = vmul.f32 %v324_v2, %v133_v56  ;;  %v102_v9 = vsel %vm101_vm3, %v322_v57, %v98_v4  ;;  %vm140_vm5 = vweird.f32 %v324_v2 }
  0xb3   :  { %v107_v12 = vsel %vm104_vm4, %v106_v5, %v102_v9  ;;  %vm141_vm7 = vmor %vm139_vm6, %vm140_vm5 }
  0xb4   :  { %v136_v11 = vsub.f32 1.0, %v135_v8  ;;  %v108_v16 = vmul.f32 %v107_v12, %v83_v10 }
  0xb6   :  { %v137_v17 = vmul.f32 %v324_v2, %v136_v11  ;;  %v271_v23 = vclamps-f32 %v108_v16, 1.0 }
  0xb8   :  { %v138_v20 = vadd.f32 %v324_v2, %v137_v17  ;;  %v151_v27 = vadd.f32 1.0, %v271_v23 }
  0xba   :  { %v142_v24 = vsel %vm141_vm7, %v324_v2, %v138_v20  ;;  %v153_v31 = vmul.f32 %v151_v27, %v67_v28 }
  0xbb   :  { %v147_v25 = vsel %vm144_vm8, %v146_v21, %v142_v24 }
  0xbc   :  { %v148_v26 = vmul.f32 %v147_v25, %v123_v22 }
  0xbe   :  { %v272_v7 = vclamps-f32 %v148_v26, 1.0 }
  0xc0   :  { %v152_v30 = vadd.f32 1.0, %v272_v7 }
  0xc2   :  { %v154_v32 = vmul.f32 %v152_v30, %v68_v29 }
  0xc4   :  { %v155_v33 = vpack.c.bf16 %v154_v32, %v153_v31 }
  0xc6   :  { %232 = vmatmul.bf16.vlgmr.msra.gmra.mxu1 %v155_v33 }
 0x143   :  { %v233_v34 = vpop.f32.mrf.mxu1 }
 0x144   :  { %v234_v35 = vadd.f32 %v320_v18, %v233_v34 }
 0x146   :  { %238 = vst.msk [vmem:[#allocation2] sm:$0xff] %vm49_vm0, %v234_v35 }
 0x14b   :  { %v235_v6 = vpop.f32.mrf.mxu1 }
 0x14c   :  { %v236_v14 = vadd.f32 %v320_v18, %v235_v6 }
 0x14e   :  { %239 = vst.msk [vmem:[#allocation2 + $0x8] sm:$0xff] %vm49_vm0, %v236_v14 }
 0x14f   :  { %252 = dma.vmem_to_hbm [thread:$0]  %s245_s16, 256, %s247_s19, [#allocation3], %s352_s20, %s352_s20, %s353_s21  }
 0x150   :  { %349 = dma.done.wait [#allocation3], 256  }
 0x151   :  { %350 = vsyncadd [#allocation3], 4294967040 }
 0x152   :  { %257 = vsyncpa [#allocation3], 1 }

</bundles_post_ra>
